<compile_context>
chip_gen: v6e
topology: v6e:2x2x1
jax: 0.10.0
libtpu: 0.0.40
codegen_flags: <defaults>
</compile_context>

<pallas_src>
import functools

import jax
import jax.numpy as jnp
from jax import lax
from jax.experimental import pallas as pl
from jax.experimental.pallas import tpu as pltpu

EPS = 1e-5  # torch InstanceNorm2d default


def _resnet_block_kernel(x_ref, w1_ref, w2_ref, o_ref, *, H, W):
    """x_ref/o_ref: (1, C, H*W) f32 (spatial axis on lanes).
    w*_ref: (9, C_out, C_in) bf16, tap-major (index = dy*3 + dx)."""
    C = o_ref.shape[1]
    HW = H * W

    # Per-pixel column index, for reflect handling at the left/right image edges.
    col = lax.broadcasted_iota(jnp.int32, (1, HW), 1) % W
    left_edge = col == 0
    right_edge = col == (W - 1)

    def shift_rows(v, sy):
        # p[h, w] = v[reflect(h + sy), w]   with reflect(-1) = 1, reflect(H) = H - 2
        if sy == 0:
            return v
        if sy < 0:
            return jnp.concatenate([v[:, W:2 * W], v[:, :(H - 1) * W]], axis=1)
        return jnp.concatenate([v[:, W:], v[:, (H - 2) * W:(H - 1) * W]], axis=1)

    def col_taps(r):
        # (left, center, right): left[h,w] = r[h, reflect(w-1)], right[h,w] = r[h, reflect(w+1)]
        prev = jnp.concatenate([r[:, :1], r[:, :-1]], axis=1)   # value at flat index i-1
        nxt = jnp.concatenate([r[:, 1:], r[:, -1:]], axis=1)    # value at flat index i+1
        left = jnp.where(left_edge, nxt, prev)
        right = jnp.where(right_edge, prev, nxt)
        return left, r, right

    def conv3x3_in(act, w_ref):
        """reflect-pad -> 3x3 conv (9 accumulating bf16 MXU dots) -> InstanceNorm."""
        acc = jnp.zeros((C, HW), jnp.float32)
        for dy in range(3):
            rowed = shift_rows(act, dy - 1)
            for dx, tap in enumerate(col_taps(rowed)):
                w_tap = w_ref[dy * 3 + dx]                      # (C_out, C_in) bf16
                acc = acc + jnp.dot(w_tap, tap.astype(jnp.bfloat16),
                                    preferred_element_type=jnp.float32)
        # InstanceNorm2d(affine=False): two-pass statistics, all in f32.
        # (conv bias omitted on purpose -- the mean subtraction cancels it exactly)
        mean = jnp.mean(acc, axis=1, keepdims=True)
        cen = acc - mean
        var = jnp.mean(cen * cen, axis=1, keepdims=True)
        return cen * lax.rsqrt(var + EPS)

    # stage 1: reflect-pad -> conv -> IN -> ReLU   (everything stays in VMEM/regs)
    y = jnp.maximum(conv3x3_in(x_ref[0], w1_ref), 0.0)
    # TODO(synk): use_dropout branch (nn.Dropout(0.5)) omitted -- configured off.
    # stage 2: reflect-pad -> conv -> IN -> residual add (x re-read only here)
    z = conv3x3_in(y, w2_ref)
    o_ref[0] = x_ref[0] + z


@jax.jit
def resnet_block(x_nchw, w1, b1, w2, b2):
    """PyTorch-layout inputs: x (B,C,H,W) NCHW, w* (C,C,3,3) OIHW, b* (C,).

    b1/b2 are accepted for nn.Conv2d(bias=True) API parity but unused: a per-channel
    bias is removed exactly by InstanceNorm2d(affine=False)'s mean subtraction."""
    del b1, b2
    B, C, H, W = x_nchw.shape
    HW = H * W
    x = x_nchw.reshape(B, C, HW).astype(jnp.float32)   # free reshape, no transpose pass

    def to_taps(w):  # OIHW -> (9, C_out, C_in), bf16 MXU operands
        return jnp.transpose(w, (2, 3, 0, 1)).reshape(9, C, C).astype(jnp.bfloat16)

    w1t, w2t = to_taps(w1), to_taps(w2)

    cost = pl.CostEstimate(
        flops=4 * B * HW * 9 * C * C,                 # 2 convs * 2 flops/MAC
        transcendentals=2 * B * C,                    # one rsqrt per channel per stage
        bytes_accessed=2 * x.size * 4 + (w1t.size + w2t.size) * 2)

    out = pl.pallas_call(
        functools.partial(_resnet_block_kernel, H=H, W=W),
        out_shape=jax.ShapeDtypeStruct((B, C, HW), jnp.float32),
        grid=(B,),
        in_specs=[
            pl.BlockSpec((1, C, HW), lambda b: (b, 0, 0)),
            pl.BlockSpec((9, C, C), lambda b: (0, 0, 0)),
            pl.BlockSpec((9, C, C), lambda b: (0, 0, 0)),
        ],
        out_specs=pl.BlockSpec((1, C, HW), lambda b: (b, 0, 0)),
        input_output_aliases={0: 0},          # residual output reuses the x buffer
        cost_estimate=cost,
        compiler_params=pltpu.CompilerParams(
            dimension_semantics=("parallel",),        # batch steps shard across TCs (v7x)
            vmem_limit_bytes=48 * 1024 * 1024),       # safe under v7x's 64 MiB physical
    )(x, w1t, w2t)

    # TODO(synk): for production sizes (H,W >= 64, C >= 128) add an H-tile grid axis with
    # a 3-sweep schedule (conv1 + stats -> conv2 + stats -> normalize + residual) so a full
    # image never has to be VMEM-resident on v7x, and build taps from an NHWC pad scratch
    # (C on lanes) instead of lane shifts once C itself is lane-dense.
    return out.reshape(B, C, H, W)


# ----------------------------- pure-JAX reference -----------------------------
def _reflect_pad_nchw(x):
    return jnp.pad(x, ((0, 0), (0, 0), (1, 1), (1, 1)), mode="reflect")


def _instance_norm_nchw(y):
    mean = jnp.mean(y, axis=(2, 3), keepdims=True)
    var = jnp.mean(jnp.square(y - mean), axis=(2, 3), keepdims=True)
    return (y - mean) * lax.rsqrt(var + EPS)


def resnet_block_ref(x, w1, b1, w2, b2):
    dn = ("NCHW", "OIHW", "NCHW")
    y = lax.conv_general_dilated(_reflect_pad_nchw(x), w1, (1, 1), "VALID",
                                 dimension_numbers=dn) + b1[None, :, None, None]
    y = jnp.maximum(_instance_norm_nchw(y), 0.0)
    z = lax.conv_general_dilated(_reflect_pad_nchw(y), w2, (1, 1), "VALID",
                                 dimension_numbers=dn) + b2[None, :, None, None]
    return x + _instance_norm_nchw(z)


if __name__ == "__main__":
    B, C, H, W = 2, 4, 16, 16   # dim = 4
    key = jax.random.PRNGKey(0)
    kx, kw1, kb1, kw2, kb2 = jax.random.split(key, 5)

    x = jax.random.normal(kx, (B, C, H, W), jnp.float32)

    # nn.Conv2d(dim, dim, 3, bias=True) params in PyTorch OIHW layout; fan_in = 9*C.
    bound = 1.0 / (9 * C) ** 0.5
    w1 = jax.random.uniform(kw1, (C, C, 3, 3), jnp.float32, -bound, bound)
    b1 = jax.random.uniform(kb1, (C,), jnp.float32, -bound, bound)
    w2 = jax.random.uniform(kw2, (C, C, 3, 3), jnp.float32, -bound, bound)
    b2 = jax.random.uniform(kb2, (C,), jnp.float32, -bound, bound)

    out = jax.block_until_ready(resnet_block(x, w1, b1, w2, b2))
    ref = jax.block_until_ready(resnet_block_ref(x, w1, b1, w2, b2))

    assert out.shape == (B, C, H, W)
    scale = float(jnp.max(jnp.abs(ref)))
    max_err = float(jnp.max(jnp.abs(out - ref)))
    # bf16 MXU operands (f32 accumulation + f32 IN statistics): allow ~1-3% of range.
    assert max_err < 3e-2 * scale, f"mismatch vs reference: {max_err:.4e} (scale {scale:.3f})"
    print("KERNEL_OK")
</pallas_src>

<mosaic_0001>
module attributes {stable_mosaic.version = 11 : i64} {
  func.func @_resnet_block_kernel(%arg0: i32, %arg1: memref<1x4x256xf32, #tpu.memory_space<vmem>>, %arg2: memref<9x4x4xbf16, #tpu.memory_space<vmem>>, %arg3: memref<9x4x4xbf16, #tpu.memory_space<vmem>>, %arg4: memref<1x4x256xf32, #tpu.memory_space<vmem>>) attributes {dimension_semantics = [#tpu.dimension_semantics<parallel>], iteration_bounds = array<i64: 2>, scalar_prefetch = 0 : i64, scratch_operands = 0 : i64, tpu.core_type = #tpu.core_type<tc>, window_params = [{transform_indices = @transform_0, window_bounds = array<i64: 1, 4, 256>}, {pipeline_mode = #tpu.pipeline_mode<synchronous>, transform_indices = @transform_1, window_bounds = array<i64: 9, 4, 4>}, {pipeline_mode = #tpu.pipeline_mode<synchronous>, transform_indices = @transform_2, window_bounds = array<i64: 9, 4, 4>}, {transform_indices = @transform_3, window_bounds = array<i64: 1, 4, 256>}]} {
    %0 = tpu.iota {dimensions = array<i32: 1>} : vector<1x256xi32>
    %c16_i32 = arith.constant 16 : i32
    %c0_i32 = arith.constant 0 : i32
    %1 = arith.cmpi eq, %c16_i32, %c0_i32 : i32
    %c1_i32 = arith.constant 1 : i32
    %2 = arith.select %1, %c1_i32, %c16_i32 : i32
    %3 = vector.broadcast %2 : i32 to vector<1x256xi32>
    %4 = arith.remsi %0, %3 : vector<1x256xi32>
    %c0_i32_0 = arith.constant 0 : i32
    %5 = vector.broadcast %c0_i32_0 : i32 to vector<1x256xi32>
    %6 = arith.cmpi ne, %4, %5 : vector<1x256xi32>
    %c0_i32_1 = arith.constant 0 : i32
    %7 = vector.broadcast %c0_i32_1 : i32 to vector<1x256xi32>
    %8 = arith.cmpi slt, %4, %7 : vector<1x256xi32>
    %c0_i32_2 = arith.constant 0 : i32
    %9 = arith.cmpi slt, %2, %c0_i32_2 : i32
    %10 = vector.broadcast %9 : i1 to vector<1x256xi1>
    %11 = vector.broadcast %10 : vector<1x256xi1> to vector<1x256xi1>
    %12 = arith.xori %8, %11 : vector<1x256xi1>
    %13 = arith.andi %12, %6 : vector<1x256xi1>
    %14 = vector.broadcast %2 : i32 to vector<1x256xi32>
    %15 = arith.addi %4, %14 : vector<1x256xi32>
    %16 = arith.select %13, %15, %4 : vector<1x256xi1>, vector<1x256xi32>
    %c0_i32_3 = arith.constant 0 : i32
    %17 = vector.broadcast %c0_i32_3 : i32 to vector<1x256xi32>
    %18 = arith.cmpi eq, %16, %17 : vector<1x256xi32>
    %c15_i32 = arith.constant 15 : i32
    %19 = vector.broadcast %c15_i32 : i32 to vector<1x256xi32>
    %20 = arith.cmpi eq, %16, %19 : vector<1x256xi32>
    %c0 = arith.constant 0 : index
    %c0_4 = arith.constant 0 : index
    %c0_5 = arith.constant 0 : index
    %21 = vector.load %arg1[%c0, %c0_4, %c0_5] : memref<1x4x256xf32, #tpu.memory_space<vmem>>, vector<1x4x256xf32>
    %22 = vector.shape_cast %21 : vector<1x4x256xf32> to vector<4x256xf32>
    %cst = arith.constant 0.000000e+00 : f32
    %23 = vector.broadcast %cst : f32 to vector<4x256xf32>
    %24 = vector.extract_strided_slice %22 {offsets = [0, 16], sizes = [4, 16], strides = [1, 1]} : vector<4x256xf32> to vector<4x16xf32>
    %25 = vector.extract_strided_slice %22 {offsets = [0, 0], sizes = [4, 240], strides = [1, 1]} : vector<4x256xf32> to vector<4x240xf32>
    %26 = tpu.concatenate %24, %25 in 1 : vector<4x16xf32>, vector<4x240xf32> -> vector<4x256xf32>
    %27 = vector.extract_strided_slice %26 {offsets = [0, 0], sizes = [4, 1], strides = [1, 1]} : vector<4x256xf32> to vector<4x1xf32>
    %28 = vector.extract_strided_slice %26 {offsets = [0, 0], sizes = [4, 255], strides = [1, 1]} : vector<4x256xf32> to vector<4x255xf32>
    %29 = tpu.concatenate %27, %28 in 1 : vector<4x1xf32>, vector<4x255xf32> -> vector<4x256xf32>
    %30 = vector.extract_strided_slice %26 {offsets = [0, 1], sizes = [4, 255], strides = [1, 1]} : vector<4x256xf32> to vector<4x255xf32>
    %31 = vector.extract_strided_slice %26 {offsets = [0, 255], sizes = [4, 1], strides = [1, 1]} : vector<4x256xf32> to vector<4x1xf32>
    %32 = tpu.concatenate %30, %31 in 1 : vector<4x255xf32>, vector<4x1xf32> -> vector<4x256xf32>
    %33 = vector.shape_cast %18 : vector<1x256xi1> to vector<1x256xi1>
    %34 = vector.broadcast %33 : vector<1x256xi1> to vector<4x256xi1>
    %35 = arith.select %34, %32, %29 : vector<4x256xi1>, vector<4x256xf32>
    %36 = vector.shape_cast %20 : vector<1x256xi1> to vector<1x256xi1>
    %37 = vector.broadcast %36 : vector<1x256xi1> to vector<4x256xi1>
    %38 = arith.select %37, %29, %32 : vector<4x256xi1>, vector<4x256xf32>
    %c0_6 = arith.constant 0 : index
    %c0_7 = arith.constant 0 : index
    %c0_8 = arith.constant 0 : index
    %39 = vector.load %arg2[%c0_6, %c0_7, %c0_8] : memref<9x4x4xbf16, #tpu.memory_space<vmem>>, vector<1x4x4xbf16>
    %40 = vector.shape_cast %39 : vector<1x4x4xbf16> to vector<4x4xbf16>
    %41 = arith.truncf %35 : vector<4x256xf32> to vector<4x256xbf16>
    %cst_9 = arith.constant dense<0.000000e+00> : vector<4x256xf32>
    %42 = tpu.matmul %40, %41, %cst_9 {dimension_numbers = #tpu.dot_dimension_numbers<[1], [0], [0], [1], [0, 0, 1, 1], [], []>} : vector<4x4xbf16>, vector<4x256xbf16>, vector<4x256xf32> -> vector<4x256xf32>
    %43 = arith.addf %23, %42 : vector<4x256xf32>
    %c1 = arith.constant 1 : index
    %c0_10 = arith.constant 0 : index
    %c0_11 = arith.constant 0 : index
    %44 = vector.load %arg2[%c1, %c0_10, %c0_11] : memref<9x4x4xbf16, #tpu.memory_space<vmem>>, vector<1x4x4xbf16>
    %45 = vector.shape_cast %44 : vector<1x4x4xbf16> to vector<4x4xbf16>
    %46 = arith.truncf %26 : vector<4x256xf32> to vector<4x256xbf16>
    %cst_12 = arith.constant dense<0.000000e+00> : vector<4x256xf32>
    %47 = tpu.matmul %45, %46, %cst_12 {dimension_numbers = #tpu.dot_dimension_numbers<[1], [0], [0], [1], [0, 0, 1, 1], [], []>} : vector<4x4xbf16>, vector<4x256xbf16>, vector<4x256xf32> -> vector<4x256xf32>
    %48 = arith.addf %43, %47 : vector<4x256xf32>
    %c2 = arith.constant 2 : index
    %c0_13 = arith.constant 0 : index
    %c0_14 = arith.constant 0 : index
    %49 = vector.load %arg2[%c2, %c0_13, %c0_14] : memref<9x4x4xbf16, #tpu.memory_space<vmem>>, vector<1x4x4xbf16>
    %50 = vector.shape_cast %49 : vector<1x4x4xbf16> to vector<4x4xbf16>
    %51 = arith.truncf %38 : vector<4x256xf32> to vector<4x256xbf16>
    %cst_15 = arith.constant dense<0.000000e+00> : vector<4x256xf32>
    %52 = tpu.matmul %50, %51, %cst_15 {dimension_numbers = #tpu.dot_dimension_numbers<[1], [0], [0], [1], [0, 0, 1, 1], [], []>} : vector<4x4xbf16>, vector<4x256xbf16>, vector<4x256xf32> -> vector<4x256xf32>
    %53 = arith.addf %48, %52 : vector<4x256xf32>
    %54 = vector.extract_strided_slice %22 {offsets = [0, 0], sizes = [4, 1], strides = [1, 1]} : vector<4x256xf32> to vector<4x1xf32>
    %55 = vector.extract_strided_slice %22 {offsets = [0, 0], sizes = [4, 255], strides = [1, 1]} : vector<4x256xf32> to vector<4x255xf32>
    %56 = tpu.concatenate %54, %55 in 1 : vector<4x1xf32>, vector<4x255xf32> -> vector<4x256xf32>
    %57 = vector.extract_strided_slice %22 {offsets = [0, 1], sizes = [4, 255], strides = [1, 1]} : vector<4x256xf32> to vector<4x255xf32>
    %58 = vector.extract_strided_slice %22 {offsets = [0, 255], sizes = [4, 1], strides = [1, 1]} : vector<4x256xf32> to vector<4x1xf32>
    %59 = tpu.concatenate %57, %58 in 1 : vector<4x255xf32>, vector<4x1xf32> -> vector<4x256xf32>
    %60 = vector.shape_cast %18 : vector<1x256xi1> to vector<1x256xi1>
    %61 = vector.broadcast %60 : vector<1x256xi1> to vector<4x256xi1>
    %62 = arith.select %61, %59, %56 : vector<4x256xi1>, vector<4x256xf32>
    %63 = vector.shape_cast %20 : vector<1x256xi1> to vector<1x256xi1>
    %64 = vector.broadcast %63 : vector<1x256xi1> to vector<4x256xi1>
    %65 = arith.select %64, %56, %59 : vector<4x256xi1>, vector<4x256xf32>
    %c3 = arith.constant 3 : index
    %c0_16 = arith.constant 0 : index
    %c0_17 = arith.constant 0 : index
    %66 = vector.load %arg2[%c3, %c0_16, %c0_17] : memref<9x4x4xbf16, #tpu.memory_space<vmem>>, vector<1x4x4xbf16>
    %67 = vector.shape_cast %66 : vector<1x4x4xbf16> to vector<4x4xbf16>
    %68 = arith.truncf %62 : vector<4x256xf32> to vector<4x256xbf16>
    %cst_18 = arith.constant dense<0.000000e+00> : vector<4x256xf32>
    %69 = tpu.matmul %67, %68, %cst_18 {dimension_numbers = #tpu.dot_dimension_numbers<[1], [0], [0], [1], [0, 0, 1, 1], [], []>} : vector<4x4xbf16>, vector<4x256xbf16>, vector<4x256xf32> -> vector<4x256xf32>
    %70 = arith.addf %53, %69 : vector<4x256xf32>
    %c4 = arith.constant 4 : index
    %c0_19 = arith.constant 0 : index
    %c0_20 = arith.constant 0 : index
    %71 = vector.load %arg2[%c4, %c0_19, %c0_20] : memref<9x4x4xbf16, #tpu.memory_space<vmem>>, vector<1x4x4xbf16>
    %72 = vector.shape_cast %71 : vector<1x4x4xbf16> to vector<4x4xbf16>
    %73 = arith.truncf %22 : vector<4x256xf32> to vector<4x256xbf16>
    %cst_21 = arith.constant dense<0.000000e+00> : vector<4x256xf32>
    %74 = tpu.matmul %72, %73, %cst_21 {dimension_numbers = #tpu.dot_dimension_numbers<[1], [0], [0], [1], [0, 0, 1, 1], [], []>} : vector<4x4xbf16>, vector<4x256xbf16>, vector<4x256xf32> -> vector<4x256xf32>
    %75 = arith.addf %70, %74 : vector<4x256xf32>
    %c5 = arith.constant 5 : index
    %c0_22 = arith.constant 0 : index
    %c0_23 = arith.constant 0 : index
    %76 = vector.load %arg2[%c5, %c0_22, %c0_23] : memref<9x4x4xbf16, #tpu.memory_space<vmem>>, vector<1x4x4xbf16>
    %77 = vector.shape_cast %76 : vector<1x4x4xbf16> to vector<4x4xbf16>
    %78 = arith.truncf %65 : vector<4x256xf32> to vector<4x256xbf16>
    %cst_24 = arith.constant dense<0.000000e+00> : vector<4x256xf32>
    %79 = tpu.matmul %77, %78, %cst_24 {dimension_numbers = #tpu.dot_dimension_numbers<[1], [0], [0], [1], [0, 0, 1, 1], [], []>} : vector<4x4xbf16>, vector<4x256xbf16>, vector<4x256xf32> -> vector<4x256xf32>
    %80 = arith.addf %75, %79 : vector<4x256xf32>
    %81 = vector.extract_strided_slice %22 {offsets = [0, 16], sizes = [4, 240], strides = [1, 1]} : vector<4x256xf32> to vector<4x240xf32>
    %82 = vector.extract_strided_slice %22 {offsets = [0, 224], sizes = [4, 16], strides = [1, 1]} : vector<4x256xf32> to vector<4x16xf32>
    %83 = tpu.concatenate %81, %82 in 1 : vector<4x240xf32>, vector<4x16xf32> -> vector<4x256xf32>
    %84 = vector.extract_strided_slice %83 {offsets = [0, 0], sizes = [4, 1], strides = [1, 1]} : vector<4x256xf32> to vector<4x1xf32>
    %85 = vector.extract_strided_slice %83 {offsets = [0, 0], sizes = [4, 255], strides = [1, 1]} : vector<4x256xf32> to vector<4x255xf32>
    %86 = tpu.concatenate %84, %85 in 1 : vector<4x1xf32>, vector<4x255xf32> -> vector<4x256xf32>
    %87 = vector.extract_strided_slice %83 {offsets = [0, 1], sizes = [4, 255], strides = [1, 1]} : vector<4x256xf32> to vector<4x255xf32>
    %88 = vector.extract_strided_slice %83 {offsets = [0, 255], sizes = [4, 1], strides = [1, 1]} : vector<4x256xf32> to vector<4x1xf32>
    %89 = tpu.concatenate %87, %88 in 1 : vector<4x255xf32>, vector<4x1xf32> -> vector<4x256xf32>
    %90 = vector.shape_cast %18 : vector<1x256xi1> to vector<1x256xi1>
    %91 = vector.broadcast %90 : vector<1x256xi1> to vector<4x256xi1>
    %92 = arith.select %91, %89, %86 : vector<4x256xi1>, vector<4x256xf32>
    %93 = vector.shape_cast %20 : vector<1x256xi1> to vector<1x256xi1>
    %94 = vector.broadcast %93 : vector<1x256xi1> to vector<4x256xi1>
    %95 = arith.select %94, %86, %89 : vector<4x256xi1>, vector<4x256xf32>
    %c6 = arith.constant 6 : index
    %c0_25 = arith.constant 0 : index
    %c0_26 = arith.constant 0 : index
    %96 = vector.load %arg2[%c6, %c0_25, %c0_26] : memref<9x4x4xbf16, #tpu.memory_space<vmem>>, vector<1x4x4xbf16>
    %97 = vector.shape_cast %96 : vector<1x4x4xbf16> to vector<4x4xbf16>
    %98 = arith.truncf %92 : vector<4x256xf32> to vector<4x256xbf16>
    %cst_27 = arith.constant dense<0.000000e+00> : vector<4x256xf32>
    %99 = tpu.matmul %97, %98, %cst_27 {dimension_numbers = #tpu.dot_dimension_numbers<[1], [0], [0], [1], [0, 0, 1, 1], [], []>} : vector<4x4xbf16>, vector<4x256xbf16>, vector<4x256xf32> -> vector<4x256xf32>
    %100 = arith.addf %80, %99 : vector<4x256xf32>
    %c7 = arith.constant 7 : index
    %c0_28 = arith.constant 0 : index
    %c0_29 = arith.constant 0 : index
    %101 = vector.load %arg2[%c7, %c0_28, %c0_29] : memref<9x4x4xbf16, #tpu.memory_space<vmem>>, vector<1x4x4xbf16>
    %102 = vector.shape_cast %101 : vector<1x4x4xbf16> to vector<4x4xbf16>
    %103 = arith.truncf %83 : vector<4x256xf32> to vector<4x256xbf16>
    %cst_30 = arith.constant dense<0.000000e+00> : vector<4x256xf32>
    %104 = tpu.matmul %102, %103, %cst_30 {dimension_numbers = #tpu.dot_dimension_numbers<[1], [0], [0], [1], [0, 0, 1, 1], [], []>} : vector<4x4xbf16>, vector<4x256xbf16>, vector<4x256xf32> -> vector<4x256xf32>
    %105 = arith.addf %100, %104 : vector<4x256xf32>
    %c8 = arith.constant 8 : index
    %c0_31 = arith.constant 0 : index
    %c0_32 = arith.constant 0 : index
    %106 = vector.load %arg2[%c8, %c0_31, %c0_32] : memref<9x4x4xbf16, #tpu.memory_space<vmem>>, vector<1x4x4xbf16>
    %107 = vector.shape_cast %106 : vector<1x4x4xbf16> to vector<4x4xbf16>
    %108 = arith.truncf %95 : vector<4x256xf32> to vector<4x256xbf16>
    %cst_33 = arith.constant dense<0.000000e+00> : vector<4x256xf32>
    %109 = tpu.matmul %107, %108, %cst_33 {dimension_numbers = #tpu.dot_dimension_numbers<[1], [0], [0], [1], [0, 0, 1, 1], [], []>} : vector<4x4xbf16>, vector<4x256xbf16>, vector<4x256xf32> -> vector<4x256xf32>
    %110 = arith.addf %105, %109 : vector<4x256xf32>
    %cst_34 = arith.constant dense<0.000000e+00> : vector<4xf32>
    %111 = vector.multi_reduction <add>, %110, %cst_34 [1] : vector<4x256xf32> to vector<4xf32>
    %112 = vector.shape_cast %111 : vector<4xf32> to vector<4x1xf32>
    %cst_35 = arith.constant 2.560000e+02 : f32
    %113 = vector.broadcast %cst_35 : f32 to vector<4x1xf32>
    %114 = arith.divf %112, %113 : vector<4x1xf32>
    %115 = vector.broadcast %114 : vector<4x1xf32> to vector<4x256xf32>
    %116 = arith.subf %110, %115 : vector<4x256xf32>
    %117 = arith.mulf %116, %116 : vector<4x256xf32>
    %cst_36 = arith.constant dense<0.000000e+00> : vector<4xf32>
    %118 = vector.multi_reduction <add>, %117, %cst_36 [1] : vector<4x256xf32> to vector<4xf32>
    %119 = vector.shape_cast %118 : vector<4xf32> to vector<4x1xf32>
    %cst_37 = arith.constant 2.560000e+02 : f32
    %120 = vector.broadcast %cst_37 : f32 to vector<4x1xf32>
    %121 = arith.divf %119, %120 : vector<4x1xf32>
    %cst_38 = arith.constant 9.99999974E-6 : f32
    %122 = vector.broadcast %cst_38 : f32 to vector<4x1xf32>
    %123 = arith.addf %121, %122 : vector<4x1xf32>
    %124 = math.rsqrt %123 : vector<4x1xf32>
    %125 = vector.broadcast %124 : vector<4x1xf32> to vector<4x256xf32>
    %126 = arith.mulf %116, %125 : vector<4x256xf32>
    %cst_39 = arith.constant 0.000000e+00 : f32
    %127 = vector.broadcast %cst_39 : f32 to vector<4x256xf32>
    %128 = arith.maximumf %126, %127 : vector<4x256xf32>
    %cst_40 = arith.constant 0.000000e+00 : f32
    %129 = vector.broadcast %cst_40 : f32 to vector<4x256xf32>
    %130 = vector.extract_strided_slice %128 {offsets = [0, 16], sizes = [4, 16], strides = [1, 1]} : vector<4x256xf32> to vector<4x16xf32>
    %131 = vector.extract_strided_slice %128 {offsets = [0, 0], sizes = [4, 240], strides = [1, 1]} : vector<4x256xf32> to vector<4x240xf32>
    %132 = tpu.concatenate %130, %131 in 1 : vector<4x16xf32>, vector<4x240xf32> -> vector<4x256xf32>
    %133 = vector.extract_strided_slice %132 {offsets = [0, 0], sizes = [4, 1], strides = [1, 1]} : vector<4x256xf32> to vector<4x1xf32>
    %134 = vector.extract_strided_slice %132 {offsets = [0, 0], sizes = [4, 255], strides = [1, 1]} : vector<4x256xf32> to vector<4x255xf32>
    %135 = tpu.concatenate %133, %134 in 1 : vector<4x1xf32>, vector<4x255xf32> -> vector<4x256xf32>
    %136 = vector.extract_strided_slice %132 {offsets = [0, 1], sizes = [4, 255], strides = [1, 1]} : vector<4x256xf32> to vector<4x255xf32>
    %137 = vector.extract_strided_slice %132 {offsets = [0, 255], sizes = [4, 1], strides = [1, 1]} : vector<4x256xf32> to vector<4x1xf32>
    %138 = tpu.concatenate %136, %137 in 1 : vector<4x255xf32>, vector<4x1xf32> -> vector<4x256xf32>
    %139 = vector.shape_cast %18 : vector<1x256xi1> to vector<1x256xi1>
    %140 = vector.broadcast %139 : vector<1x256xi1> to vector<4x256xi1>
    %141 = arith.select %140, %138, %135 : vector<4x256xi1>, vector<4x256xf32>
    %142 = vector.shape_cast %20 : vector<1x256xi1> to vector<1x256xi1>
    %143 = vector.broadcast %142 : vector<1x256xi1> to vector<4x256xi1>
    %144 = arith.select %143, %135, %138 : vector<4x256xi1>, vector<4x256xf32>
    %c0_41 = arith.constant 0 : index
    %c0_42 = arith.constant 0 : index
    %c0_43 = arith.constant 0 : index
    %145 = vector.load %arg3[%c0_41, %c0_42, %c0_43] : memref<9x4x4xbf16, #tpu.memory_space<vmem>>, vector<1x4x4xbf16>
    %146 = vector.shape_cast %145 : vector<1x4x4xbf16> to vector<4x4xbf16>
    %147 = arith.truncf %141 : vector<4x256xf32> to vector<4x256xbf16>
    %cst_44 = arith.constant dense<0.000000e+00> : vector<4x256xf32>
    %148 = tpu.matmul %146, %147, %cst_44 {dimension_numbers = #tpu.dot_dimension_numbers<[1], [0], [0], [1], [0, 0, 1, 1], [], []>} : vector<4x4xbf16>, vector<4x256xbf16>, vector<4x256xf32> -> vector<4x256xf32>
    %149 = arith.addf %129, %148 : vector<4x256xf32>
    %c1_45 = arith.constant 1 : index
    %c0_46 = arith.constant 0 : index
    %c0_47 = arith.constant 0 : index
    %150 = vector.load %arg3[%c1_45, %c0_46, %c0_47] : memref<9x4x4xbf16, #tpu.memory_space<vmem>>, vector<1x4x4xbf16>
    %151 = vector.shape_cast %150 : vector<1x4x4xbf16> to vector<4x4xbf16>
    %152 = arith.truncf %132 : vector<4x256xf32> to vector<4x256xbf16>
    %cst_48 = arith.constant dense<0.000000e+00> : vector<4x256xf32>
    %153 = tpu.matmul %151, %152, %cst_48 {dimension_numbers = #tpu.dot_dimension_numbers<[1], [0], [0], [1], [0, 0, 1, 1], [], []>} : vector<4x4xbf16>, vector<4x256xbf16>, vector<4x256xf32> -> vector<4x256xf32>
    %154 = arith.addf %149, %153 : vector<4x256xf32>
    %c2_49 = arith.constant 2 : index
    %c0_50 = arith.constant 0 : index
    %c0_51 = arith.constant 0 : index
    %155 = vector.load %arg3[%c2_49, %c0_50, %c0_51] : memref<9x4x4xbf16, #tpu.memory_space<vmem>>, vector<1x4x4xbf16>
    %156 = vector.shape_cast %155 : vector<1x4x4xbf16> to vector<4x4xbf16>
    %157 = arith.truncf %144 : vector<4x256xf32> to vector<4x256xbf16>
    %cst_52 = arith.constant dense<0.000000e+00> : vector<4x256xf32>
    %158 = tpu.matmul %156, %157, %cst_52 {dimension_numbers = #tpu.dot_dimension_numbers<[1], [0], [0], [1], [0, 0, 1, 1], [], []>} : vector<4x4xbf16>, vector<4x256xbf16>, vector<4x256xf32> -> vector<4x256xf32>
    %159 = arith.addf %154, %158 : vector<4x256xf32>
    %160 = vector.extract_strided_slice %128 {offsets = [0, 0], sizes = [4, 1], strides = [1, 1]} : vector<4x256xf32> to vector<4x1xf32>
    %161 = vector.extract_strided_slice %128 {offsets = [0, 0], sizes = [4, 255], strides = [1, 1]} : vector<4x256xf32> to vector<4x255xf32>
    %162 = tpu.concatenate %160, %161 in 1 : vector<4x1xf32>, vector<4x255xf32> -> vector<4x256xf32>
    %163 = vector.extract_strided_slice %128 {offsets = [0, 1], sizes = [4, 255], strides = [1, 1]} : vector<4x256xf32> to vector<4x255xf32>
    %164 = vector.extract_strided_slice %128 {offsets = [0, 255], sizes = [4, 1], strides = [1, 1]} : vector<4x256xf32> to vector<4x1xf32>
    %165 = tpu.concatenate %163, %164 in 1 : vector<4x255xf32>, vector<4x1xf32> -> vector<4x256xf32>
    %166 = vector.shape_cast %18 : vector<1x256xi1> to vector<1x256xi1>
    %167 = vector.broadcast %166 : vector<1x256xi1> to vector<4x256xi1>
    %168 = arith.select %167, %165, %162 : vector<4x256xi1>, vector<4x256xf32>
    %169 = vector.shape_cast %20 : vector<1x256xi1> to vector<1x256xi1>
    %170 = vector.broadcast %169 : vector<1x256xi1> to vector<4x256xi1>
    %171 = arith.select %170, %162, %165 : vector<4x256xi1>, vector<4x256xf32>
    %c3_53 = arith.constant 3 : index
    %c0_54 = arith.constant 0 : index
    %c0_55 = arith.constant 0 : index
    %172 = vector.load %arg3[%c3_53, %c0_54, %c0_55] : memref<9x4x4xbf16, #tpu.memory_space<vmem>>, vector<1x4x4xbf16>
    %173 = vector.shape_cast %172 : vector<1x4x4xbf16> to vector<4x4xbf16>
    %174 = arith.truncf %168 : vector<4x256xf32> to vector<4x256xbf16>
    %cst_56 = arith.constant dense<0.000000e+00> : vector<4x256xf32>
    %175 = tpu.matmul %173, %174, %cst_56 {dimension_numbers = #tpu.dot_dimension_numbers<[1], [0], [0], [1], [0, 0, 1, 1], [], []>} : vector<4x4xbf16>, vector<4x256xbf16>, vector<4x256xf32> -> vector<4x256xf32>
    %176 = arith.addf %159, %175 : vector<4x256xf32>
    %c4_57 = arith.constant 4 : index
    %c0_58 = arith.constant 0 : index
    %c0_59 = arith.constant 0 : index
    %177 = vector.load %arg3[%c4_57, %c0_58, %c0_59] : memref<9x4x4xbf16, #tpu.memory_space<vmem>>, vector<1x4x4xbf16>
    %178 = vector.shape_cast %177 : vector<1x4x4xbf16> to vector<4x4xbf16>
    %179 = arith.truncf %128 : vector<4x256xf32> to vector<4x256xbf16>
    %cst_60 = arith.constant dense<0.000000e+00> : vector<4x256xf32>
    %180 = tpu.matmul %178, %179, %cst_60 {dimension_numbers = #tpu.dot_dimension_numbers<[1], [0], [0], [1], [0, 0, 1, 1], [], []>} : vector<4x4xbf16>, vector<4x256xbf16>, vector<4x256xf32> -> vector<4x256xf32>
    %181 = arith.addf %176, %180 : vector<4x256xf32>
    %c5_61 = arith.constant 5 : index
    %c0_62 = arith.constant 0 : index
    %c0_63 = arith.constant 0 : index
    %182 = vector.load %arg3[%c5_61, %c0_62, %c0_63] : memref<9x4x4xbf16, #tpu.memory_space<vmem>>, vector<1x4x4xbf16>
    %183 = vector.shape_cast %182 : vector<1x4x4xbf16> to vector<4x4xbf16>
    %184 = arith.truncf %171 : vector<4x256xf32> to vector<4x256xbf16>
    %cst_64 = arith.constant dense<0.000000e+00> : vector<4x256xf32>
    %185 = tpu.matmul %183, %184, %cst_64 {dimension_numbers = #tpu.dot_dimension_numbers<[1], [0], [0], [1], [0, 0, 1, 1], [], []>} : vector<4x4xbf16>, vector<4x256xbf16>, vector<4x256xf32> -> vector<4x256xf32>
    %186 = arith.addf %181, %185 : vector<4x256xf32>
    %187 = vector.extract_strided_slice %128 {offsets = [0, 16], sizes = [4, 240], strides = [1, 1]} : vector<4x256xf32> to vector<4x240xf32>
    %188 = vector.extract_strided_slice %128 {offsets = [0, 224], sizes = [4, 16], strides = [1, 1]} : vector<4x256xf32> to vector<4x16xf32>
    %189 = tpu.concatenate %187, %188 in 1 : vector<4x240xf32>, vector<4x16xf32> -> vector<4x256xf32>
    %190 = vector.extract_strided_slice %189 {offsets = [0, 0], sizes = [4, 1], strides = [1, 1]} : vector<4x256xf32> to vector<4x1xf32>
    %191 = vector.extract_strided_slice %189 {offsets = [0, 0], sizes = [4, 255], strides = [1, 1]} : vector<4x256xf32> to vector<4x255xf32>
    %192 = tpu.concatenate %190, %191 in 1 : vector<4x1xf32>, vector<4x255xf32> -> vector<4x256xf32>
    %193 = vector.extract_strided_slice %189 {offsets = [0, 1], sizes = [4, 255], strides = [1, 1]} : vector<4x256xf32> to vector<4x255xf32>
    %194 = vector.extract_strided_slice %189 {offsets = [0, 255], sizes = [4, 1], strides = [1, 1]} : vector<4x256xf32> to vector<4x1xf32>
    %195 = tpu.concatenate %193, %194 in 1 : vector<4x255xf32>, vector<4x1xf32> -> vector<4x256xf32>
    %196 = vector.shape_cast %18 : vector<1x256xi1> to vector<1x256xi1>
    %197 = vector.broadcast %196 : vector<1x256xi1> to vector<4x256xi1>
    %198 = arith.select %197, %195, %192 : vector<4x256xi1>, vector<4x256xf32>
    %199 = vector.shape_cast %20 : vector<1x256xi1> to vector<1x256xi1>
    %200 = vector.broadcast %199 : vector<1x256xi1> to vector<4x256xi1>
    %201 = arith.select %200, %192, %195 : vector<4x256xi1>, vector<4x256xf32>
    %c6_65 = arith.constant 6 : index
    %c0_66 = arith.constant 0 : index
    %c0_67 = arith.constant 0 : index
    %202 = vector.load %arg3[%c6_65, %c0_66, %c0_67] : memref<9x4x4xbf16, #tpu.memory_space<vmem>>, vector<1x4x4xbf16>
    %203 = vector.shape_cast %202 : vector<1x4x4xbf16> to vector<4x4xbf16>
    %204 = arith.truncf %198 : vector<4x256xf32> to vector<4x256xbf16>
    %cst_68 = arith.constant dense<0.000000e+00> : vector<4x256xf32>
    %205 = tpu.matmul %203, %204, %cst_68 {dimension_numbers = #tpu.dot_dimension_numbers<[1], [0], [0], [1], [0, 0, 1, 1], [], []>} : vector<4x4xbf16>, vector<4x256xbf16>, vector<4x256xf32> -> vector<4x256xf32>
    %206 = arith.addf %186, %205 : vector<4x256xf32>
    %c7_69 = arith.constant 7 : index
    %c0_70 = arith.constant 0 : index
    %c0_71 = arith.constant 0 : index
    %207 = vector.load %arg3[%c7_69, %c0_70, %c0_71] : memref<9x4x4xbf16, #tpu.memory_space<vmem>>, vector<1x4x4xbf16>
    %208 = vector.shape_cast %207 : vector<1x4x4xbf16> to vector<4x4xbf16>
    %209 = arith.truncf %189 : vector<4x256xf32> to vector<4x256xbf16>
    %cst_72 = arith.constant dense<0.000000e+00> : vector<4x256xf32>
    %210 = tpu.matmul %208, %209, %cst_72 {dimension_numbers = #tpu.dot_dimension_numbers<[1], [0], [0], [1], [0, 0, 1, 1], [], []>} : vector<4x4xbf16>, vector<4x256xbf16>, vector<4x256xf32> -> vector<4x256xf32>
    %211 = arith.addf %206, %210 : vector<4x256xf32>
    %c8_73 = arith.constant 8 : index
    %c0_74 = arith.constant 0 : index
    %c0_75 = arith.constant 0 : index
    %212 = vector.load %arg3[%c8_73, %c0_74, %c0_75] : memref<9x4x4xbf16, #tpu.memory_space<vmem>>, vector<1x4x4xbf16>
    %213 = vector.shape_cast %212 : vector<1x4x4xbf16> to vector<4x4xbf16>
    %214 = arith.truncf %201 : vector<4x256xf32> to vector<4x256xbf16>
    %cst_76 = arith.constant dense<0.000000e+00> : vector<4x256xf32>
    %215 = tpu.matmul %213, %214, %cst_76 {dimension_numbers = #tpu.dot_dimension_numbers<[1], [0], [0], [1], [0, 0, 1, 1], [], []>} : vector<4x4xbf16>, vector<4x256xbf16>, vector<4x256xf32> -> vector<4x256xf32>
    %216 = arith.addf %211, %215 : vector<4x256xf32>
    %cst_77 = arith.constant dense<0.000000e+00> : vector<4xf32>
    %217 = vector.multi_reduction <add>, %216, %cst_77 [1] : vector<4x256xf32> to vector<4xf32>
    %218 = vector.shape_cast %217 : vector<4xf32> to vector<4x1xf32>
    %cst_78 = arith.constant 2.560000e+02 : f32
    %219 = vector.broadcast %cst_78 : f32 to vector<4x1xf32>
    %220 = arith.divf %218, %219 : vector<4x1xf32>
    %221 = vector.broadcast %220 : vector<4x1xf32> to vector<4x256xf32>
    %222 = arith.subf %216, %221 : vector<4x256xf32>
    %223 = arith.mulf %222, %222 : vector<4x256xf32>
    %cst_79 = arith.constant dense<0.000000e+00> : vector<4xf32>
    %224 = vector.multi_reduction <add>, %223, %cst_79 [1] : vector<4x256xf32> to vector<4xf32>
    %225 = vector.shape_cast %224 : vector<4xf32> to vector<4x1xf32>
    %cst_80 = arith.constant 2.560000e+02 : f32
    %226 = vector.broadcast %cst_80 : f32 to vector<4x1xf32>
    %227 = arith.divf %225, %226 : vector<4x1xf32>
    %cst_81 = arith.constant 9.99999974E-6 : f32
    %228 = vector.broadcast %cst_81 : f32 to vector<4x1xf32>
    %229 = arith.addf %227, %228 : vector<4x1xf32>
    %230 = math.rsqrt %229 : vector<4x1xf32>
    %231 = vector.broadcast %230 : vector<4x1xf32> to vector<4x256xf32>
    %232 = arith.mulf %222, %231 : vector<4x256xf32>
    %c0_82 = arith.constant 0 : index
    %c0_83 = arith.constant 0 : index
    %c0_84 = arith.constant 0 : index
    %233 = vector.load %arg1[%c0_82, %c0_83, %c0_84] : memref<1x4x256xf32, #tpu.memory_space<vmem>>, vector<1x4x256xf32>
    %234 = vector.shape_cast %233 : vector<1x4x256xf32> to vector<4x256xf32>
    %235 = arith.addf %234, %232 : vector<4x256xf32>
    %c0_85 = arith.constant 0 : index
    %c0_86 = arith.constant 0 : index
    %c0_87 = arith.constant 0 : index
    %236 = vector.load %arg4[%c0_85, %c0_86, %c0_87] : memref<1x4x256xf32, #tpu.memory_space<vmem>>, vector<1x4x256xf32>
    %237 = vector.shape_cast %236 : vector<1x4x256xf32> to vector<4x256xf32>
    %238 = vector.shape_cast %235 : vector<4x256xf32> to vector<1x4x256xf32>
    tpu.vector_store %arg4[%c0_85, %c0_86, %c0_87], %238 {strides = array<i32>} : memref<1x4x256xf32, #tpu.memory_space<vmem>>, vector<1x4x256xf32>,
    return
  }
  func.func @transform_0(%arg0: i32) -> (i32, i32, i32) {
    %c0_i32 = arith.constant 0 : i32
    %c0_i32_0 = arith.constant 0 : i32
    %c0_i32_1 = arith.constant 0 : i32
    return %arg0, %c0_i32, %c0_i32_0 : i32, i32, i32
  }
  func.func @transform_1(%arg0: i32) -> (i32, i32, i32) {
    %c0_i32 = arith.constant 0 : i32
    %c0_i32_0 = arith.constant 0 : i32
    %c0_i32_1 = arith.constant 0 : i32
    %c0_i32_2 = arith.constant 0 : i32
    return %c0_i32, %c0_i32_0, %c0_i32_1 : i32, i32, i32
  }
  func.func @transform_2(%arg0: i32) -> (i32, i32, i32) {
    %c0_i32 = arith.constant 0 : i32
    %c0_i32_0 = arith.constant 0 : i32
    %c0_i32_1 = arith.constant 0 : i32
    %c0_i32_2 = arith.constant 0 : i32
    return %c0_i32, %c0_i32_0, %c0_i32_1 : i32, i32, i32
  }
  func.func @transform_3(%arg0: i32) -> (i32, i32, i32) {
    %c0_i32 = arith.constant 0 : i32
    %c0_i32_0 = arith.constant 0 : i32
    %c0_i32_1 = arith.constant 0 : i32
    return %arg0, %c0_i32, %c0_i32_0 : i32, i32, i32
  }
}

</mosaic_0001>

<bundles_post_ra>
// kernel: resnet_block.1
= control target key start
LH: loop header
LB: loop body
LE: loop exit
PB: predicated region body
PF: predicated region fallthrough
CT: control target
= control target key end

     0   :  { %s1672_s12 = smov 0   ;;  %s1999_s0 = inlined_call_operand.vmem [shape: f32[2,4,256], index: 0, kind: input, shape index: {}, may-alias: {0,3}]   ;;  %s2000_s1 = inlined_call_operand.vmem [shape: bf16[9,4,4], index: 1, kind: input, shape index: {}]   ;;  %s2001_s2 = inlined_call_operand.vmem [shape: bf16[9,4,4], index: 2, kind: input, shape index: {}]   ;;  %s2002_s3 = inlined_call_operand.vmem [shape: f32[2,4,256], index: 3, kind: output, shape index: {}, may-alias: {0,3}]  }
   0x1 LB: > { %s1486_s13 = sadd.s32 4294967295, %s1645_s12   ;;  %p1490_p0 = scmp.ge.s32.totalorder %s1645_s12, 1  ;;  %s1645_s12 = sphi %s1672_s12, %s13_s12  }
   0x2   : > { %p137_p1 = scmp.lt.s32.totalorder %s1645_s12, 3 }
   0x4   : > { %p138_p2 = pnand %p1490_p0, %p137_p1 }
   0x5   : > { %p161_p3 = scmp.lt.s32.totalorder (!%p138_p2), %s1486_s13, 1  ;;  %s1647_s18 = smov (!%p138_p2), 112  }
   0x6   : > { %141 = sbr.rel (%p138_p2) target bundleno = 1584 (0x630), region = 32  ;;  %s1648_s19 = smov (!%p138_p2), 16  }
   0x7   : > { %s1650_s20 = smov (!%p138_p2), 127   ;;  %s1651_s21 = smov (!%p138_p2), 1  }
   0xb   : > { %s2012_s13 = smov (!%p161_p3, %s1486_s13), 1  ;;  %v1649_v3 = vmov 0   ;;  %vm213_vm0 = vcmask 130048   ;;  %vm260_vm1 = vcmask 1041408   ;;  %vm605_vm2 = vcmask 916480  }
   0xc   : > { %s1549_s14 = sshll.u32 %s2012_s13, 3  ;;  %299 = vmatprep.mubr.bf16.mxu0 %v1649_v3  ;;  %349 = vmatprep.mubr.bf16.mxu1 %v1649_v3  ;;  %v1495_v15 = vld [vmem:[%s2000_s1 + $0x2] sm:$0x3]  ;;  %vm256_vm3 = vcmask 31744   ;;  %v172_v19 = vlaneseq  ;;  %vm232_vm4 = vcmask 1039360   ;;  %vm223_vm5 = vcmask 7168  }
   0xd   : > { %s165_s17 = scalar_lea.vmem %s1999_s0, %s1549_s14  ;;  %vm800_vm10 = vcmask 1043456   ;;  %s170_s9 = scalar_lea.vmem %s2002_s3, %s1549_s14 }
   0xe   : > { %v1688_v0 = vld [vmem:[%s165_s17] sm:$0xff]  ;;  %v173_v20 = vand.u32 127, %v172_v19 }
   0xf   : > { %205 = vrot.lane.b32.xlu0 %v1688_v0, %s1647_s18  ;;  %v1694_v1 = vcombine.high %v1688_v0, %v1688_v0  ;;  %v493_v35 = vpack.c.bf16 %v1688_v0, %v1688_v0 }
  0x10   : > { %v174_v21 = vadd.s32 128, %v173_v20  ;;  %v179_v23 = vand.u32 15, %v173_v20 }
  0x11   : > { %603 = vrot.lane.b32.xlu1 %v1694_v1, %s1647_s18  ;;  %v1564_v2 = vpack.i.bf16 %v1694_v1, %v1688_v0  ;;  %v494_v34 = vpack.c.bf16 %v1694_v1, %v1694_v1 }
  0x12   : > { %v186_v22 = vand.u32 15, %v174_v21  ;;  %vm1734_vm8 = vcmp.eq.s32.totalorder %v179_v23, 0  ;;  %vm1738_vm9 = vcmp.eq.s32.totalorder %v179_v23, 15 }
  0x13   : > { %1565 = vrot.lane.b32.xlu0 %v1564_v2, %s1648_s19 }
  0x14   : > { %vm1726_vm6 = vcmp.eq.s32.totalorder %v186_v22, 0  ;;  %vm1730_vm7 = vcmp.eq.s32.totalorder %v186_v22, 15 }
  0x81   : > { %v206_v4 = vpop.permute.xlu0 %205 }
  0x83   : > { %v604_v14 = vpop.permute.xlu1 %603 }
  0x84   : > { %v1718_v17 = vsel %vm605_vm2, %v206_v4, %v604_v14 }
  0x85   : > { %v1566_v5 = vpop.permute.xlu0 %1565 }
  0x86   : > { %v1568_v6 = vunpack.i.h.bf16 %v1566_v5  ;;  %v1567_v7 = vunpack.i.l.bf16 %v1566_v5 }
  0x88   : > { %v214_v8 = vsel %vm213_vm0, %v1567_v7, %v1568_v6  ;;  %v217_v9 = vsel %vm213_vm0, %v206_v4, %v1567_v7  ;;  %v1713_v16 = vsel %vm605_vm2, %v604_v14, %v1568_v6  ;;  %v249_v6 = vld [vmem:[%s2000_s1] sm:$0x3]  ;;  %v1500_v7 = vld [vmem:[%s2000_s1 + $0x4] sm:$0x3] }
  0x89   : > { %v1574_v10 = vpack.i.bf16 %v214_v8, %v217_v9  ;;  %v255_v11 = vpack.c.bf16 %v214_v8, %v214_v8  ;;  %v254_v12 = vpack.c.bf16 %v217_v9, %v217_v9  ;;  %v1594_v18 = vpack.i.bf16 %v1713_v16, %v1718_v17 }
  0x8b   : > { %1575 = vrot.lane.b32.xlu0 %v1574_v10, %s1650_s20  ;;  %1570 = vrot.lane.b32.xlu1 %v1574_v10, %s1651_s21  ;;  %v262_v13 = vsel %vm260_vm1, %v254_v12, 0  ;;  %v499_v10 = vsel %vm260_vm1, %v493_v35, 0  ;;  %v691_v35 = vpack.c.bf16 %v1713_v16, %v1713_v16 }
  0x8c   : > { %1496 = vmatprep.subr.msk.bf16.mxu0 %vm260_vm1, %v255_v11 }
  0x8d   : > { %282 = vmatpush1.bf16.msra.mxu0 %v262_v13 }
  0x8f   : > { %1585 = vrot.lane.b32.xlu0 %v1564_v2, %s1650_s20  ;;  %1580 = vrot.lane.b32.xlu1 %v1564_v2, %s1651_s21 }
  0x90   : > { %1497 = vmatmul.mubr.msk.bf16.vlgmr.msra.gmra.mxu0 %vm256_vm3, %v1495_v15 }
  0x91   : > { %403 = vmatprep.mubr.bf16.mxu0 %v1649_v3 }
  0x93   : > { %1595 = vrot.lane.b32.xlu0 %v1594_v18, %s1650_s20  ;;  %1590 = vrot.lane.b32.xlu1 %v1594_v18, %s1651_s21 }
  0xfd   : > { %v1576_v24 = vpop.permute.xlu0 %1575  ;;  %v1571_v25 = vpop.permute.xlu1 %1570 }
  0xfe   : > { %v1578_v30 = vunpack.i.h.bf16 %v1576_v24  ;;  %v1577_v31 = vunpack.i.l.bf16 %v1576_v24  ;;  %v1573_v32 = vunpack.i.h.bf16 %v1571_v25  ;;  %v1572_v33 = vunpack.i.l.bf16 %v1571_v25 }
 0x100   : > { %v224_v36 = vsel %vm223_vm5, %v1572_v33, %v1573_v32  ;;  %v236_v37 = vsel %vm232_vm4, %v1578_v30, %v214_v8  ;;  %v227_v38 = vsel %vm223_vm5, %v217_v9, %v1572_v33  ;;  %v233_v39 = vsel %vm232_vm4, %v1577_v31, %v1578_v30  ;;  %v1503_v30 = vld [vmem:[%s2000_s1 + $0x6] sm:$0x3]  ;;  %v1506_v31 = vld [vmem:[%s2000_s1 + $0x8] sm:$0x3] }
 0x101   : > { %v1586_v40 = vpop.permute.xlu0 %1585  ;;  %v1581_v41 = vpop.permute.xlu1 %1580  ;;  %v242_v42 = vsel %vm1726_vm6, %v236_v37, %v224_v36  ;;  %v248_v43 = vsel %vm1730_vm7, %v224_v36, %v236_v37  ;;  %v241_v44 = vsel %vm1734_vm8, %v233_v39, %v227_v38  ;;  %v247_v45 = vsel %vm1738_vm9, %v227_v38, %v233_v39 }
 0x102   : > { %v1588_v46 = vunpack.i.h.bf16 %v1586_v40  ;;  %v1587_v47 = vunpack.i.l.bf16 %v1586_v40  ;;  %v1583_v48 = vunpack.i.h.bf16 %v1581_v41  ;;  %v1582_v49 = vunpack.i.l.bf16 %v1581_v41  ;;  %v1512_v40 = vld [vmem:[%s2000_s1 + $0xc] sm:$0x3] }
 0x103   : > { %v251_v50 = vpack.c.bf16 %v242_v42, %v242_v42  ;;  %v361_v51 = vpack.c.bf16 %v248_v43, %v248_v43  ;;  %v250_v52 = vpack.c.bf16 %v241_v44, %v241_v44  ;;  %v360_v53 = vpack.c.bf16 %v247_v45, %v247_v45  ;;  %v1518_v43 = vld [vmem:[%s2000_s1 + $0x10] sm:$0x3] }
 0x104   : > { %v430_v54 = vsel %vm232_vm4, %v1588_v46, %v1694_v1  ;;  %v426_v55 = vsel %vm232_vm4, %v1587_v47, %v1588_v46  ;;  %v418_v56 = vsel %vm223_vm5, %v1582_v49, %v1583_v48  ;;  %v421_v57 = vsel %vm223_vm5, %v1688_v0, %v1582_v49 }
 0x105   : > { %1498 = vmatprep.subr.msk.bf16.mxu1 %vm260_vm1, %v251_v50  ;;  %1501 = vmatprep.subr.msk.bf16.mxu0 %vm260_vm1, %v361_v51  ;;  %v1596_v58 = vpop.permute.xlu0 %1595  ;;  %v1591_v59 = vpop.permute.xlu1 %1590  ;;  %v312_v60 = vsel %vm260_vm1, %v250_v52, 0  ;;  %v366_v61 = vsel %vm260_vm1, %v360_v53, 0  ;;  %v432_v62 = vsel %vm1726_vm6, %v430_v54, %v418_v56  ;;  %v431_v63 = vsel %vm1734_vm8, %v426_v55, %v421_v57 }
 0x106   : > { %v1598_v1 = vunpack.i.h.bf16 %v1596_v58  ;;  %v1597_v2 = vunpack.i.l.bf16 %v1596_v58  ;;  %v1593_v4 = vunpack.i.h.bf16 %v1591_v59  ;;  %v1592_v5 = vunpack.i.l.bf16 %v1591_v59  ;;  %332 = vmatpush1.bf16.msra.mxu1 %v312_v60  ;;  %386 = vmatpush1.bf16.msra.mxu0 %v366_v61 }
 0x107   : > { %v438_v8 = vpack.c.bf16 %v432_v62, %v432_v62  ;;  %1507 = vmatprep.subr.msk.bf16.mxu0 %vm260_vm1, %v494_v34  ;;  %v437_v9 = vpack.c.bf16 %v431_v63, %v431_v63  ;;  %v434_v11 = vsel %vm1730_vm7, %v418_v56, %v430_v54  ;;  %v433_v22 = vsel %vm1738_vm9, %v421_v57, %v426_v55 }
 0x108   : > { %v627_v12 = vsel %vm232_vm4, %v1598_v1, %v1713_v16  ;;  %v624_v13 = vsel %vm232_vm4, %v1597_v2, %v1598_v1  ;;  %v616_v14 = vsel %vm223_vm5, %v1592_v5, %v1593_v4  ;;  %v619_v15 = vsel %vm223_vm5, %v1718_v17, %v1592_v5  ;;  %v1509_v16 = vld [vmem:[%s2000_s1 + $0xa] sm:$0x3] }
 0x109   : > { %1499 = vmatmul.mubr.msk.bf16.vlgmr.msra.gmra.mxu1 %vm256_vm3, %v249_v6  ;;  %1502 = vmatmul.mubr.msk.bf16.vlgmr.msra.gmra.mxu0 %vm256_vm3, %v1500_v7  ;;  %v443_v18 = vsel %vm260_vm1, %v437_v9, 0  ;;  %v550_v19 = vpack.c.bf16 %v434_v11, %v434_v11  ;;  %v629_v20 = vsel %vm1726_vm6, %v627_v12, %v616_v14  ;;  %v628_v23 = vsel %vm1734_vm8, %v624_v13, %v619_v15 }
 0x10a   : > { %1504 = vmatprep.subr.msk.bf16.mxu1 %vm260_vm1, %v438_v8  ;;  %519 = vmatpush1.bf16.msra.mxu0 %v499_v10  ;;  %v635_v21 = vpack.c.bf16 %v629_v20, %v629_v20  ;;  %v549_v24 = vpack.c.bf16 %v433_v22, %v433_v22  ;;  %v634_v25 = vpack.c.bf16 %v628_v23, %v628_v23 }
 0x10b   : > { %463 = vmatpush1.bf16.msra.mxu1 %v443_v18  ;;  %480 = vmatprep.mubr.bf16.mxu1 %v1649_v3  ;;  %v631_v32 = vsel %vm1730_vm7, %v616_v14, %v627_v12  ;;  %v630_v37 = vsel %vm1738_vm9, %v619_v15, %v624_v13  ;;  %v690_v38 = vpack.c.bf16 %v1718_v17, %v1718_v17  ;;  %v1515_v17 = vld [vmem:[%s2000_s1 + $0xe] sm:$0x3] }
 0x10c   : > { %1510 = vmatprep.subr.msk.bf16.mxu1 %vm260_vm1, %v550_v19  ;;  %1513 = vmatprep.subr.msk.bf16.mxu0 %vm260_vm1, %v635_v21  ;;  %v555_v33 = vsel %vm260_vm1, %v549_v24, 0  ;;  %v640_v34 = vsel %vm260_vm1, %v634_v25, 0  ;;  %v747_v36 = vpack.c.bf16 %v631_v32, %v631_v32  ;;  %v746_v39 = vpack.c.bf16 %v630_v37, %v630_v37 }
 0x10d   : > { %536 = vmatprep.mubr.bf16.mxu0 %v1649_v3  ;;  %v696_v41 = vsel %vm260_vm1, %v690_v38, 0 }
 0x10e   : > { %v752_v42 = vsel %vm260_vm1, %v746_v39, 0 }
 0x111   : > { %1505 = vmatmul.mubr.msk.bf16.vlgmr.msra.gmra.mxu1 %vm256_vm3, %v1503_v30  ;;  %1508 = vmatmul.mubr.msk.bf16.vlgmr.msra.gmra.mxu0 %vm256_vm3, %v1506_v31 }
 0x112   : > { %575 = vmatpush1.bf16.msra.mxu1 %v555_v33  ;;  %660 = vmatpush1.bf16.msra.mxu0 %v640_v34 }
 0x113   : > { %1516 = vmatprep.subr.msk.bf16.mxu1 %vm260_vm1, %v691_v35  ;;  %1519 = vmatprep.subr.msk.bf16.mxu0 %vm260_vm1, %v747_v36 }
 0x114   : > { %592 = vmatprep.mubr.bf16.mxu1 %v1649_v3  ;;  %677 = vmatprep.mubr.bf16.mxu0 %v1649_v3 }
 0x119   : > { %1511 = vmatmul.mubr.msk.bf16.vlgmr.msra.gmra.mxu1 %vm256_vm3, %v1509_v16  ;;  %1514 = vmatmul.mubr.msk.bf16.vlgmr.msra.gmra.mxu0 %vm256_vm3, %v1512_v40 }
 0x11a   : > { %716 = vmatpush1.bf16.msra.mxu1 %v696_v41  ;;  %772 = vmatpush1.bf16.msra.mxu0 %v752_v42 }
 0x11b   : > { %733 = vmatprep.mubr.bf16.mxu1 %v1649_v3  ;;  %789 = vmatprep.mubr.bf16.mxu0 %v1649_v3 }
 0x121   : > { %1517 = vmatmul.mubr.msk.bf16.vlgmr.msra.gmra.mxu1 %vm256_vm3, %v1515_v17  ;;  %1520 = vmatmul.mubr.msk.bf16.vlgmr.msra.gmra.mxu0 %vm256_vm3, %v1518_v43 }
 0x122   : > { %906 = vmatprep.mubr.bf16.mxu1 %v1649_v3  ;;  %956 = vmatprep.mubr.bf16.mxu0 %v1649_v3 }
 0x150   : > { %v301_v44 = vpop.f32.mrf.mxu0 }
 0x152   : > { %v303_v45 = vpop.f32.mrf.mxu0 }
 0x154   : > { %v305_v46 = vpop.f32.mrf.mxu0 }
 0x156   : > { %v306_v47 = vpop.f32.mrf.mxu0 }
 0x1c9   : > { %v351_v48 = vpop.f32.mrf.mxu1  ;;  %v405_v49 = vpop.f32.mrf.mxu0 }
 0x1ca   : > { %v352_v56 = vadd.f32 %v351_v48, %v301_v44 }
 0x1cb   : > { %v353_v50 = vpop.f32.mrf.mxu1  ;;  %v407_v51 = vpop.f32.mrf.mxu0 }
 0x1cc   : > { %v354_v59 = vadd.f32 %v353_v50, %v303_v45  ;;  %v412_v62 = vadd.f32 %v405_v49, %v352_v56 }
 0x1cd   : > { %v355_v52 = vpop.f32.mrf.mxu1  ;;  %v409_v53 = vpop.f32.mrf.mxu0 }
 0x1ce   : > { %v413_v2 = vadd.f32 %v407_v51, %v354_v59 }
 0x1cf   : > { %v356_v54 = vpop.f32.mrf.mxu1  ;;  %v410_v55 = vpop.f32.mrf.mxu0 }
 0x1d1   : > { %v482_v57 = vpop.f32.mrf.mxu1  ;;  %v538_v58 = vpop.f32.mrf.mxu0 }
 0x1d2   : > { %v489_v4 = vadd.f32 %v482_v57, %v412_v62 }
 0x1d3   : > { %v484_v60 = vpop.f32.mrf.mxu1  ;;  %v540_v61 = vpop.f32.mrf.mxu0 }
 0x1d4   : > { %v490_v7 = vadd.f32 %v484_v60, %v413_v2  ;;  %v545_v10 = vadd.f32 %v538_v58, %v489_v4 }
 0x1d5   : > { %v486_v63 = vpop.f32.mrf.mxu1  ;;  %v542_v1 = vpop.f32.mrf.mxu0 }
 0x1d6   : > { %v546_v13 = vadd.f32 %v540_v61, %v490_v7 }
 0x1d7   : > { %v487_v5 = vpop.f32.mrf.mxu1  ;;  %v543_v6 = vpop.f32.mrf.mxu0 }
 0x1d9   : > { %v594_v8 = vpop.f32.mrf.mxu1  ;;  %v679_v9 = vpop.f32.mrf.mxu0 }
 0x1da   : > { %v601_v14 = vadd.f32 %v594_v8, %v545_v10  ;;  %v1521_v8 = vld [vmem:[%s2001_s2 + $0x2] sm:$0x3] }
 0x1db   : > { %v596_v11 = vpop.f32.mrf.mxu1  ;;  %v681_v12 = vpop.f32.mrf.mxu0 }
 0x1dc   : > { %v602_v19 = vadd.f32 %v596_v11, %v546_v13  ;;  %v686_v22 = vadd.f32 %v679_v9, %v601_v14 }
 0x1dd   : > { %v598_v15 = vpop.f32.mrf.mxu1  ;;  %v683_v18 = vpop.f32.mrf.mxu0 }
 0x1de   : > { %v687_v25 = vadd.f32 %v681_v12, %v602_v19 }
 0x1df   : > { %v599_v20 = vpop.f32.mrf.mxu1  ;;  %v684_v21 = vpop.f32.mrf.mxu0 }
 0x1e1   : > { %v735_v23 = vpop.f32.mrf.mxu1  ;;  %v791_v24 = vpop.f32.mrf.mxu0 }
 0x1e2   : > { %v742_v30 = vadd.f32 %v735_v23, %v686_v22 }
 0x1e3   : > { %v737_v31 = vpop.f32.mrf.mxu1  ;;  %v793_v32 = vpop.f32.mrf.mxu0 }
 0x1e4   : > { %v798_v33 = vadd.f32 %v791_v24, %v742_v30  ;;  %v743_v34 = vadd.f32 %v737_v31, %v687_v25 }
 0x1e5   : > { %v739_v35 = vpop.f32.mrf.mxu1  ;;  %v795_v36 = vpop.f32.mrf.mxu0 }
 0x1e6   : > { %v799_v37 = vadd.f32 %v793_v32, %v743_v34  ;;  %v801_v16 = vsel %vm800_vm10, %v798_v33, 0.0 }
 0x1e7   : > { %v740_v38 = vpop.f32.mrf.mxu1  ;;  %v796_v39 = vpop.f32.mrf.mxu0 }
 0x1e8   : > { %v802_v40 = vsel %vm800_vm10, %v799_v37, 0.0 }
 0x1e9   : > { %v803_v41 = vadd.f32 %v802_v40, %v801_v16 }
 0x1eb   : > { %804 = vadd.xlane.f32.xlu1 %v803_v41 }
 0x274   : > { %v805_v42 = vpop.xlane.xlu1 %804 }
 0x275   : > { %v807_v17 = vmul.f32 0.00390625, %v805_v42 }
 0x277   : > { %v808_v43 = vsub.f32 %v798_v33, %v807_v17  ;;  %v809_v44 = vsub.f32 %v799_v37, %v807_v17 }
 0x279   : > { %v810_v45 = vmul.f32 %v808_v43, %v808_v43  ;;  %v811_v46 = vmul.f32 %v809_v44, %v809_v44 }
 0x27b   : > { %v812_v47 = vsel %vm800_vm10, %v810_v45, 0.0  ;;  %v813_v48 = vsel %vm800_vm10, %v811_v46, 0.0 }
 0x27c   : > { %v814_v49 = vadd.f32 %v813_v48, %v812_v47 }
 0x27e   : > { %815 = vadd.xlane.f32.xlu0 %v814_v49 }
 0x307   : > { %v816_v50 = vpop.xlane.xlu0 %815 }
 0x308   : > { %v817_v51 = vmul.f32 0.00390625, %v816_v50 }
 0x30a   : > { %v818_v52 = vadd.f32 1e-05, %v817_v51 }
 0x30c   : > { %1635 = vrsqrt.f32 %v818_v52 }
 0x319   : > { %v1636_v53 = vpop.eup %1635 }
 0x31a   : > { %v820_v54 = vmul.f32 %v1636_v53, %v808_v43  ;;  %v821_v55 = vmul.f32 %v1636_v53, %v809_v44 }
 0x31c   : > { %v1850_v56 = vmax.f32 %v820_v54, 0.0  ;;  %v1852_v57 = vmax.f32 %v821_v55, 0.0 }
 0x31e   : > { %825 = vrot.lane.b32.xlu0 %v1850_v56, %s1647_s18  ;;  %v1599_v58 = vpack.i.bf16 %v1852_v57, %v1850_v56  ;;  %v1100_v25 = vpack.c.bf16 %v1852_v57, %v1852_v57 }
 0x320   : > { %1600 = vrot.lane.b32.xlu1 %v1599_v58, %s1648_s19 }
 0x324   : > { %1209 = vrot.lane.b32.xlu1 %v1852_v57, %s1647_s18 }
 0x390   : > { %v826_v62 = vpop.permute.xlu0 %825 }
 0x392   : > { %v1601_v59 = vpop.permute.xlu1 %1600 }
 0x393   : > { %v1603_v60 = vunpack.i.h.bf16 %v1601_v59  ;;  %v1602_v61 = vunpack.i.l.bf16 %v1601_v59  ;;  %v1099_v59 = vpack.c.bf16 %v1850_v56, %v1850_v56 }
 0x395   : > { %v833_v63 = vsel %vm213_vm0, %v1602_v61, %v1603_v60  ;;  %v836_v1 = vsel %vm213_vm0, %v826_v62, %v1602_v61  ;;  %v1526_v61 = vld [vmem:[%s2001_s2 + $0x4] sm:$0x3] }
 0x396   : > { %v864_v2 = vpack.c.bf16 %v833_v63, %v833_v63  ;;  %v1609_v4 = vpack.i.bf16 %v833_v63, %v836_v1  ;;  %v863_v5 = vpack.c.bf16 %v836_v1, %v836_v1  ;;  %v1210_v6 = vpop.permute.xlu1 %1209 }
 0x397   : > { %v1871_v9 = vsel %vm605_vm2, %v826_v62, %v1210_v6  ;;  %v1874_v10 = vsel %vm605_vm2, %v1210_v6, %v1603_v60 }
 0x398   : > { %1522 = vmatprep.subr.msk.bf16.mxu1 %vm260_vm1, %v864_v2  ;;  %1610 = vrot.lane.b32.xlu1 %v1609_v4, %s1650_s20  ;;  %v869_v7 = vsel %vm260_vm1, %v863_v5, 0  ;;  %v1629_v11 = vpack.i.bf16 %v1874_v10, %v1871_v9 }
 0x399   : > { %1605 = vrot.lane.b32.xlu0 %v1609_v4, %s1651_s21  ;;  %889 = vmatpush1.bf16.msra.mxu1 %v869_v7  ;;  %v1105_v7 = vsel %vm260_vm1, %v1099_v59, 0 }
 0x39c   : > { %1620 = vrot.lane.b32.xlu1 %v1599_v58, %s1650_s20  ;;  %1523 = vmatmul.mubr.msk.bf16.vlgmr.msra.gmra.mxu1 %vm256_vm3, %v1521_v8 }
 0x39d   : > { %1615 = vrot.lane.b32.xlu0 %v1599_v58, %s1651_s21  ;;  %1010 = vmatprep.mubr.bf16.mxu1 %v1649_v3 }
 0x3a0   : > { %1630 = vrot.lane.b32.xlu1 %v1629_v11, %s1650_s20 }
 0x3a1   : > { %1625 = vrot.lane.b32.xlu0 %v1629_v11, %s1651_s21 }
 0x40a   : > { %v1611_v12 = vpop.permute.xlu1 %1610 }
 0x40b   : > { %v1613_v13 = vunpack.i.h.bf16 %v1611_v12  ;;  %v1612_v14 = vunpack.i.l.bf16 %v1611_v12  ;;  %v1606_v15 = vpop.permute.xlu0 %1605  ;;  %v1529_v12 = vld [vmem:[%s2001_s2 + $0x6] sm:$0x3] }
 0x40c   : > { %v1608_v18 = vunpack.i.h.bf16 %v1606_v15  ;;  %v1607_v19 = vunpack.i.l.bf16 %v1606_v15  ;;  %v1296_v15 = vpack.c.bf16 %v1874_v10, %v1874_v10 }
 0x40d   : > { %v853_v20 = vsel %vm232_vm4, %v1613_v13, %v833_v63  ;;  %v850_v21 = vsel %vm232_vm4, %v1612_v14, %v1613_v13  ;;  %v1532_v14 = vld [vmem:[%s2001_s2 + $0x8] sm:$0x3] }
 0x40e   : > { %v842_v22 = vsel %vm223_vm5, %v1607_v19, %v1608_v18  ;;  %v845_v23 = vsel %vm223_vm5, %v836_v1, %v1607_v19  ;;  %v1621_v24 = vpop.permute.xlu1 %1620 }
 0x40f   : > { %v1623_v30 = vunpack.i.h.bf16 %v1621_v24  ;;  %v1622_v31 = vunpack.i.l.bf16 %v1621_v24  ;;  %v1616_v32 = vpop.permute.xlu0 %1615  ;;  %v855_v33 = vsel %vm1726_vm6, %v853_v20, %v842_v22  ;;  %v857_v34 = vsel %vm1730_vm7, %v842_v22, %v853_v20 }
 0x410   : > { %v1618_v35 = vunpack.i.h.bf16 %v1616_v32  ;;  %v1617_v36 = vunpack.i.l.bf16 %v1616_v32  ;;  %v860_v37 = vpack.c.bf16 %v855_v33, %v855_v33  ;;  %v968_v38 = vpack.c.bf16 %v857_v34, %v857_v34 }
 0x411   : > { %v1036_v39 = vsel %vm232_vm4, %v1623_v30, %v1852_v57  ;;  %v1033_v16 = vsel %vm232_vm4, %v1622_v31, %v1623_v30  ;;  %v854_v40 = vsel %vm1734_vm8, %v850_v21, %v845_v23  ;;  %v856_v41 = vsel %vm1738_vm9, %v845_v23, %v850_v21  ;;  %v858_v57 = vld [vmem:[%s2001_s2] sm:$0x3]  ;;  %v1535_v21 = vld [vmem:[%s2001_s2 + $0xa] sm:$0x3]  ;;  %v1538_v23 = vld [vmem:[%s2001_s2 + $0xc] sm:$0x3] }
 0x412   : > { %v1025_v42 = vsel %vm223_vm5, %v1617_v36, %v1618_v35  ;;  %v1028_v17 = vsel %vm223_vm5, %v1850_v56, %v1617_v36  ;;  %1524 = vmatprep.subr.msk.bf16.mxu0 %vm260_vm1, %v860_v37  ;;  %1527 = vmatprep.subr.msk.bf16.mxu1 %vm260_vm1, %v968_v38  ;;  %v859_v43 = vpack.c.bf16 %v854_v40, %v854_v40  ;;  %v1631_v44 = vpop.permute.xlu1 %1630 }
 0x413   : > { %v967_v45 = vpack.c.bf16 %v856_v41, %v856_v41  ;;  %v1633_v46 = vunpack.i.h.bf16 %v1631_v44  ;;  %v1632_v47 = vunpack.i.l.bf16 %v1631_v44  ;;  %v1626_v48 = vpop.permute.xlu0 %1625  ;;  %v1038_v49 = vsel %vm1726_vm6, %v1036_v39, %v1025_v42 }
 0x414   : > { %v919_v50 = vsel %vm260_vm1, %v859_v43, 0  ;;  %v1628_v51 = vunpack.i.h.bf16 %v1626_v48  ;;  %v1627_v52 = vunpack.i.l.bf16 %v1626_v48  ;;  %v1044_v53 = vpack.c.bf16 %v1038_v49, %v1038_v49 }
 0x415   : > { %939 = vmatpush1.bf16.msra.mxu0 %v919_v50  ;;  %v973_v54 = vsel %vm260_vm1, %v967_v45, 0  ;;  %v1232_v55 = vsel %vm232_vm4, %v1633_v46, %v1874_v10  ;;  %v1037_v58 = vsel %vm1734_vm8, %v1033_v16, %v1028_v17  ;;  %v1229_v63 = vsel %vm232_vm4, %v1632_v47, %v1633_v46 }
 0x416   : > { %993 = vmatpush1.bf16.msra.mxu1 %v973_v54  ;;  %v1221_v60 = vsel %vm223_vm5, %v1627_v52, %v1628_v51  ;;  %1530 = vmatprep.subr.msk.bf16.mxu0 %vm260_vm1, %v1044_v53  ;;  %v1043_v62 = vpack.c.bf16 %v1037_v58, %v1037_v58  ;;  %v1224_v1 = vsel %vm223_vm5, %v1871_v9, %v1627_v52 }
 0x417   : > { %1533 = vmatprep.subr.msk.bf16.mxu1 %vm260_vm1, %v1100_v25  ;;  %v1040_v56 = vsel %vm1730_vm7, %v1025_v42, %v1036_v39  ;;  %v1234_v2 = vsel %vm1726_vm6, %v1232_v55, %v1221_v60  ;;  %v1039_v8 = vsel %vm1738_vm9, %v1028_v17, %v1033_v16  ;;  %v1233_v26 = vsel %vm1734_vm8, %v1229_v63, %v1224_v1  ;;  %v1544_v25 = vld [vmem:[%s2001_s2 + $0x10] sm:$0x3] }
 0x418   : > { %1525 = vmatmul.mubr.msk.bf16.vlgmr.msra.gmra.mxu0 %vm256_vm3, %v858_v57  ;;  %v1049_v4 = vsel %vm260_vm1, %v1043_v62, 0  ;;  %v1156_v5 = vpack.c.bf16 %v1040_v56, %v1040_v56  ;;  %v1240_v6 = vpack.c.bf16 %v1234_v2, %v1234_v2  ;;  %v1155_v11 = vpack.c.bf16 %v1039_v8, %v1039_v8 }
 0x419   : > { %1528 = vmatmul.mubr.msk.bf16.vlgmr.msra.gmra.mxu1 %vm256_vm3, %v1526_v61  ;;  %1069 = vmatpush1.bf16.msra.mxu0 %v1049_v4  ;;  %v1239_v13 = vpack.c.bf16 %v1233_v26, %v1233_v26  ;;  %v1236_v28 = vsel %vm1730_vm7, %v1221_v60, %v1232_v55  ;;  %v1235_v27 = vsel %vm1738_vm9, %v1224_v1, %v1229_v63 }
 0x41a   : > { %1125 = vmatpush1.bf16.msra.mxu1 %v1105_v7  ;;  %1536 = vmatprep.subr.msk.bf16.mxu0 %vm260_vm1, %v1156_v5  ;;  %v1161_v18 = vsel %vm260_vm1, %v1155_v11, 0  ;;  %v1352_v20 = vpack.c.bf16 %v1236_v28, %v1236_v28  ;;  %v1295_v10 = vpack.c.bf16 %v1871_v9, %v1871_v9  ;;  %v1351_v22 = vpack.c.bf16 %v1235_v27, %v1235_v27  ;;  %v1541_v9 = vld [vmem:[%s2001_s2 + $0xe] sm:$0x3] }
 0x41b   : > { %1539 = vmatprep.subr.msk.bf16.mxu1 %vm260_vm1, %v1240_v6  ;;  %1086 = vmatprep.mubr.bf16.mxu0 %v1649_v3  ;;  %v1245_v19 = vsel %vm260_vm1, %v1239_v13, 0 }
 0x41c   : > { %1142 = vmatprep.mubr.bf16.mxu1 %v1649_v3  ;;  %v1301_v29 = vsel %vm260_vm1, %v1295_v10, 0  ;;  %v1357_v24 = vsel %vm260_vm1, %v1351_v22, 0 }
 0x420   : > { %1531 = vmatmul.mubr.msk.bf16.vlgmr.msra.gmra.mxu0 %vm256_vm3, %v1529_v12 }
 0x421   : > { %1534 = vmatmul.mubr.msk.bf16.vlgmr.msra.gmra.mxu1 %vm256_vm3, %v1532_v14  ;;  %1181 = vmatpush1.bf16.msra.mxu0 %v1161_v18 }
 0x422   : > { %1265 = vmatpush1.bf16.msra.mxu1 %v1245_v19  ;;  %1542 = vmatprep.subr.msk.bf16.mxu0 %vm260_vm1, %v1296_v15 }
 0x423   : > { %1545 = vmatprep.subr.msk.bf16.mxu1 %vm260_vm1, %v1352_v20  ;;  %1198 = vmatprep.mubr.bf16.mxu0 %v1649_v3 }
 0x424   : > { %1282 = vmatprep.mubr.bf16.mxu1 %v1649_v3 }
 0x428   : > { %1537 = vmatmul.mubr.msk.bf16.vlgmr.msra.gmra.mxu0 %vm256_vm3, %v1535_v21 }
 0x429   : > { %1540 = vmatmul.mubr.msk.bf16.vlgmr.msra.gmra.mxu1 %vm256_vm3, %v1538_v23  ;;  %1321 = vmatpush1.bf16.msra.mxu0 %v1301_v29 }
 0x42a   : > { %1377 = vmatpush1.bf16.msra.mxu1 %v1357_v24  ;;  %1338 = vmatprep.mubr.bf16.mxu0 %v1649_v3 }
 0x42b   : > { %1394 = vmatprep.mubr.bf16.mxu1 %v1649_v3 }
 0x430   : > { %1543 = vmatmul.mubr.msk.bf16.vlgmr.msra.gmra.mxu0 %vm256_vm3, %v1541_v9 }
 0x431   : > { %1546 = vmatmul.mubr.msk.bf16.vlgmr.msra.gmra.mxu1 %vm256_vm3, %v1544_v25 }
 0x45c   : > { %v908_v30 = vpop.f32.mrf.mxu1 }
 0x45e   : > { %v910_v31 = vpop.f32.mrf.mxu1 }
 0x460   : > { %v912_v32 = vpop.f32.mrf.mxu1 }
 0x462   : > { %v913_v33 = vpop.f32.mrf.mxu1 }
 0x4d8   : > { %v958_v34 = vpop.f32.mrf.mxu0 }
 0x4d9   : > { %v1012_v35 = vpop.f32.mrf.mxu1  ;;  %v959_v16 = vadd.f32 %v958_v34, %v908_v30 }
 0x4da   : > { %v960_v36 = vpop.f32.mrf.mxu0 }
 0x4db   : > { %v1014_v3 = vpop.f32.mrf.mxu1  ;;  %v961_v42 = vadd.f32 %v960_v36, %v910_v31  ;;  %v1019_v44 = vadd.f32 %v1012_v35, %v959_v16 }
 0x4dc   : > { %v962_v37 = vpop.f32.mrf.mxu0 }
 0x4dd   : > { %v1016_v38 = vpop.f32.mrf.mxu1  ;;  %v1020_v47 = vadd.f32 %v1014_v3, %v961_v42 }
 0x4de   : > { %v963_v39 = vpop.f32.mrf.mxu0 }
 0x4df   : > { %v1017_v40 = vpop.f32.mrf.mxu1 }
 0x4e0   : > { %v1088_v41 = vpop.f32.mrf.mxu0 }
 0x4e1   : > { %v1144_v17 = vpop.f32.mrf.mxu1  ;;  %v1095_v48 = vadd.f32 %v1088_v41, %v1019_v44 }
 0x4e2   : > { %v1090_v43 = vpop.f32.mrf.mxu0 }
 0x4e3   : > { %v1146_v45 = vpop.f32.mrf.mxu1  ;;  %v1096_v51 = vadd.f32 %v1090_v43, %v1020_v47  ;;  %v1151_v54 = vadd.f32 %v1144_v17, %v1095_v48 }
 0x4e4   : > { %v1092_v46 = vpop.f32.mrf.mxu0 }
 0x4e5   : > { %v1148_v49 = vpop.f32.mrf.mxu1  ;;  %v1152_v58 = vadd.f32 %v1146_v45, %v1096_v51 }
 0x4e6   : > { %v1093_v50 = vpop.f32.mrf.mxu0 }
 0x4e7   : > { %v1149_v52 = vpop.f32.mrf.mxu1 }
 0x4e8   : > { %v1200_v53 = vpop.f32.mrf.mxu0 }
 0x4e9   : > { %v1284_v55 = vpop.f32.mrf.mxu1  ;;  %v1207_v59 = vadd.f32 %v1200_v53, %v1151_v54 }
 0x4ea   : > { %v1202_v57 = vpop.f32.mrf.mxu0 }
 0x4eb   : > { %v1286_v60 = vpop.f32.mrf.mxu1  ;;  %v1208_v62 = vadd.f32 %v1202_v57, %v1152_v58  ;;  %v1291_v56 = vadd.f32 %v1284_v55, %v1207_v59 }
 0x4ec   : > { %v1204_v61 = vpop.f32.mrf.mxu0 }
 0x4ed   : > { %v1288_v63 = vpop.f32.mrf.mxu1  ;;  %v1292_v5 = vadd.f32 %v1286_v60, %v1208_v62 }
 0x4ee   : > { %v1205_v1 = vpop.f32.mrf.mxu0 }
 0x4ef   : > { %v1289_v2 = vpop.f32.mrf.mxu1 }
 0x4f0   : > { %v1340_v4 = vpop.f32.mrf.mxu0 }
 0x4f1   : > { %v1347_v6 = vadd.f32 %v1340_v4, %v1291_v56  ;;  %v1396_v7 = vpop.f32.mrf.mxu1 }
 0x4f2   : > { %v1342_v8 = vpop.f32.mrf.mxu0 }
 0x4f3   : > { %v1403_v26 = vadd.f32 %v1396_v7, %v1347_v6  ;;  %v1348_v11 = vadd.f32 %v1342_v8, %v1292_v5  ;;  %v1398_v12 = vpop.f32.mrf.mxu1 }
 0x4f4   : > { %v1344_v13 = vpop.f32.mrf.mxu0 }
 0x4f5   : > { %v1404_v14 = vadd.f32 %v1398_v12, %v1348_v11  ;;  %v1400_v28 = vpop.f32.mrf.mxu1  ;;  %v1405_v19 = vsel %vm800_vm10, %v1403_v26, 0.0 }
 0x4f6   : > { %v1345_v15 = vpop.f32.mrf.mxu0 }
 0x4f7   : > { %v1401_v18 = vpop.f32.mrf.mxu1  ;;  %v1406_v20 = vsel %vm800_vm10, %v1404_v14, 0.0 }
 0x4f8   : > { %v1407_v27 = vadd.f32 %v1406_v20, %v1405_v19 }
 0x4fa   : > { %1408 = vadd.xlane.f32.xlu0 %v1407_v27 }
 0x583   : > { %v1409_v10 = vpop.xlane.xlu0 %1408 }
 0x584   : > { %v1410_v21 = vmul.f32 0.00390625, %v1409_v10 }
 0x586   : > { %v1411_v22 = vsub.f32 %v1403_v26, %v1410_v21  ;;  %v1412_v23 = vsub.f32 %v1404_v14, %v1410_v21 }
 0x588   : > { %v1413_v29 = vmul.f32 %v1411_v22, %v1411_v22  ;;  %v1414_v24 = vmul.f32 %v1412_v23, %v1412_v23 }
 0x58a   : > { %v1415_v9 = vsel %vm800_vm10, %v1413_v29, 0.0  ;;  %v1416_v25 = vsel %vm800_vm10, %v1414_v24, 0.0 }
 0x58b   : > { %v1417_v30 = vadd.f32 %v1416_v25, %v1415_v9 }
 0x58d   : > { %1418 = vadd.xlane.f32.xlu1 %v1417_v30 }
 0x616   : > { %v1419_v31 = vpop.xlane.xlu1 %1418 }
 0x617   : > { %v1420_v32 = vmul.f32 0.00390625, %v1419_v31 }
 0x619   : > { %v1421_v33 = vadd.f32 1e-05, %v1420_v32 }
 0x61b   : > { %1637 = vrsqrt.f32 %v1421_v33 }
 0x628   : > { %v1638_v34 = vpop.eup %1637 }
 0x629   : > { %v1423_v35 = vmul.f32 %v1638_v34, %v1411_v22  ;;  %v1424_v36 = vmul.f32 %v1638_v34, %v1412_v23 }
 0x62b   : > { %v1427_v3 = vcombine.low %v1423_v35, %v1424_v36 }
 0x62d   : > { %v1429_v37 = vadd.f32 %v1427_v3, %v1688_v0 }
 0x62f   : > { %1430 = vst [vmem:[%s170_s9] sm:$0xff] %v1429_v37 }
 0x630 PF: > { %s13_s12 = sadd.s32 1, %s1645_s12  }
 0x631   : > { %p10_p4 = scmp.ge.s32.totalorder %s13_s12, 4  }
 0x633   :  { %12 = sbr.rel (!%p10_p4) target bundleno = 1 (0x1), region = 78 }

</bundles_post_ra>
